<compile_context>
chip_gen: v7x
topology: tpu7x:2x2x1
jax: 0.10.0
libtpu: 0.0.40
codegen_flags: <defaults>
</compile_context>

<pallas_src>
import functools

import jax
import jax.numpy as jnp
from jax import lax
from jax.experimental import pallas as pl
from jax.experimental.pallas import tpu as pltpu


_SQRT_HALF = 0.7071067811865476


def _round_up(x, m):
    return (x + m - 1) // m * m


def _gelu(x, approximate):
    if approximate:
        # tanh form — routed to the EUP (own bundle slot), frees the VALU.
        c = 0.7978845608028654  # sqrt(2/pi)
        return 0.5 * x * (1.0 + jnp.tanh(c * (x + 0.044715 * x * x * x)))
    # Exact erf form matches torch.nn.GELU() default.
    # TODO(synk): on v5e (no bf16 VALU, weak MXU) flip approximate=True if
    # exact-erf parity with torch is not required — erf is a long VALU polynomial.
    return 0.5 * x * (1.0 + lax.erf(x * _SQRT_HALF))


def _vmem_capacity_bytes():
    try:
        info = pltpu.get_tpu_info()
        cap = getattr(info, "vmem_capacity_bytes", None)
        if cap:
            return int(cap)
    except Exception:
        pass
    return 64 * 1024 * 1024  # conservative fallback (v7x per-TC VMEM)


def prepare_glu_weight(w, *, tn=256):
    """One-time weight preprocessing (do this at param init, NOT per call).

    w: [d_model, 2 * d_out]  (transposed vs. torch nn.Linear.weight, bias-free)
    Returns (w_prepped [k_p, n_col * 2*tn], d_out, tn) where each 2*tn-wide
    column block j holds [value columns of tile j | gate columns of tile j].
    """
    d_model, two_d_out = w.shape
    assert two_d_out % 2 == 0
    d_out = two_d_out // 2

    tn = _round_up(max(tn, 128), 128)
    tn = min(tn, _round_up(d_out, 128))          # don't over-tile small d_out
    d_out_p = _round_up(d_out, tn)
    n_col = d_out_p // tn
    k_p = _round_up(d_model, 128)

    wv = jnp.pad(w[:, :d_out], ((0, k_p - d_model), (0, d_out_p - d_out)))
    wg = jnp.pad(w[:, d_out:], ((0, k_p - d_model), (0, d_out_p - d_out)))
    wi = jnp.concatenate(
        [wv.reshape(k_p, n_col, tn), wg.reshape(k_p, n_col, tn)], axis=-1
    )  # (k_p, n_col, 2*tn): per-tile value|gate interleave
    return wi.reshape(k_p, n_col * 2 * tn), d_out, tn


def glu_kernel(x_ref, w_ref, o_ref, *, tn, approximate):
    # Single fused MXU pass for both halves: (tm, k_p) @ (k_p, 2*tn).
    acc = jnp.dot(x_ref[...], w_ref[...], preferred_element_type=jnp.float32)
    value = acc[:, :tn]          # lane-aligned slice (tn is a multiple of 128)
    gate = acc[:, tn:]
    o_ref[...] = (_gelu(gate, approximate) * value).astype(o_ref.dtype)


def gated_linear_unit(f, w_prepped, d_out, tn, *, tm=512, approximate_gelu=False):
    """GLU forward with a pre-prepared (padded + interleaved) weight.

    f:         [..., d_model]
    w_prepped: [k_p, n_col * 2*tn]  from prepare_glu_weight
    returns:   [..., d_out]  = GELU(gate) * value
    """
    orig_shape = f.shape
    d_model = orig_shape[-1]
    k_p, w_cols = w_prepped.shape
    assert w_cols % (2 * tn) == 0
    n_col = w_cols // (2 * tn)
    d_out_p = n_col * tn
    assert k_p >= d_model and k_p % 128 == 0

    x2d = f.reshape(-1, d_model)
    N = x2d.shape[0]

    # ---- row tiling ------------------------------------------------------
    x_isz = jnp.dtype(x2d.dtype).itemsize
    w_isz = jnp.dtype(w_prepped.dtype).itemsize
    o_isz = jnp.dtype(f.dtype).itemsize
    sub = max(8, 32 // x_isz)                    # sublane multiple per dtype
    tm = _round_up(max(tm, sub), sub)
    tm = min(tm, _round_up(N, sub))              # don't over-tile tiny inputs

    # ---- VMEM budget (x/out double-buffered, one weight slab double-buffered)
    def vmem_est(tm_):
        return (2 * tm_ * k_p * x_isz            # x tiles
                + 2 * k_p * 2 * tn * w_isz       # weight column slab
                + 2 * tm_ * tn * o_isz           # out tiles
                + 3 * tm_ * 2 * tn * 4)          # f32 acc / gelu temporaries

    cap = _vmem_capacity_bytes() - 8 * 1024 * 1024   # leave Mosaic headroom
    while vmem_est(tm) > cap and tm > sub:
        tm = max(sub, _round_up(tm // 2, sub))
    vmem_limit_bytes = int(min(max(2 * vmem_est(tm), 32 * 1024 * 1024), cap))

    n_p = _round_up(N, tm)
    n_row = n_p // tm
    xp = jnp.pad(x2d, ((0, n_p - N), (0, k_p - d_model)))

    kern = functools.partial(glu_kernel, tn=tn, approximate=approximate_gelu)

    # Grid: column axis OUTERMOST so each weight slab is DMA'd once and reused
    # across all row tiles; both axes are independent -> both "parallel".
    out_p = pl.pallas_call(
        kern,
        out_shape=jax.ShapeDtypeStruct((n_p, d_out_p), f.dtype),
        grid_spec=pltpu.PrefetchScalarGridSpec(
            num_scalar_prefetch=0,
            grid=(n_col, n_row),
            in_specs=[
                pl.BlockSpec((tm, k_p), lambda j, i: (i, 0)),       # x row tile
                pl.BlockSpec((k_p, 2 * tn), lambda j, i: (0, j)),   # weight slab
            ],
            out_specs=pl.BlockSpec((tm, tn), lambda j, i: (i, j)),
        ),
        compiler_params=pltpu.CompilerParams(
            dimension_semantics=("parallel", "parallel"),
            vmem_limit_bytes=vmem_limit_bytes,
        ),
    )(xp, w_prepped)

    out = out_p[:N, :d_out]
    return out.reshape(orig_shape[:-1] + (d_out,))


if __name__ == "__main__":
    batch, seq, d_model = 2, 8, 32
    d_out = d_model  # module default: d_out = d_model

    key = jax.random.PRNGKey(0)
    kx, kw = jax.random.split(key, 2)

    # input [batch, seq, d_model]
    f_in = jax.random.normal(kx, (batch, seq, d_model), dtype=jnp.float32)

    # nn.Linear(d_model, 2*d_out, bias=False): torch weight is [2*d_out, d_model];
    # we store the transposed [d_model, 2*d_out] version.
    bound = 1.0 / jnp.sqrt(d_model)
    w = jax.random.uniform(kw, (d_model, 2 * d_out), jnp.float32, -bound, bound)

    # One-time weight preprocessing (would live at parameter-init time).
    w_prepped, d_out_actual, tn = prepare_glu_weight(w)

    out = gated_linear_unit(f_in, w_prepped, d_out_actual, tn)
    jax.block_until_ready(out)

    # pure-JAX reference: value, gate = chunk(f @ w, 2, -1); out = gelu(gate)*value
    x2d = f_in.reshape(-1, d_model)
    proj = x2d @ w
    value_ref, gate_ref = proj[:, :d_out], proj[:, d_out:]
    gelu_ref = 0.5 * gate_ref * (1.0 + lax.erf(gate_ref * _SQRT_HALF))
    ref = (gelu_ref * value_ref).reshape(batch, seq, d_out)

    assert out.shape == ref.shape
    assert jnp.allclose(out, ref, atol=1e-5, rtol=1e-5)

    print("KERNEL_OK")
</pallas_src>

<mosaic_0001>
module attributes {stable_mosaic.version = 11 : i64} {
  func.func @glu_kernel(%arg0: i32, %arg1: i32, %arg2: memref<16x128xf32, #tpu.memory_space<vmem>>, %arg3: memref<128x256xf32, #tpu.memory_space<vmem>>, %arg4: memref<16x128xf32, #tpu.memory_space<vmem>>) attributes {dimension_semantics = [#tpu.dimension_semantics<parallel>, #tpu.dimension_semantics<parallel>], iteration_bounds = array<i64: 1, 1>, scalar_prefetch = 0 : i64, scratch_operands = 0 : i64, tpu.core_type = #tpu.core_type<tc>, window_params = [{transform_indices = @transform_0, window_bounds = array<i64: 16, 128>}, {transform_indices = @transform_1, window_bounds = array<i64: 128, 256>}, {transform_indices = @transform_2, window_bounds = array<i64: 16, 128>}]} {
    %c0 = arith.constant 0 : index
    %c0_0 = arith.constant 0 : index
    %0 = vector.load %arg2[%c0, %c0_0] : memref<16x128xf32, #tpu.memory_space<vmem>>, vector<16x128xf32>
    %c0_1 = arith.constant 0 : index
    %c0_2 = arith.constant 0 : index
    %1 = vector.load %arg3[%c0_1, %c0_2] : memref<128x256xf32, #tpu.memory_space<vmem>>, vector<128x256xf32>
    %cst = arith.constant dense<0.000000e+00> : vector<16x256xf32>
    %2 = tpu.matmul %0, %1, %cst {dimension_numbers = #tpu.dot_dimension_numbers<[1], [0], [0], [1], [0, 0, 1, 1], [], []>} : vector<16x128xf32>, vector<128x256xf32>, vector<16x256xf32> -> vector<16x256xf32>
    %3 = vector.extract_strided_slice %2 {offsets = [0, 0], sizes = [16, 128], strides = [1, 1]} : vector<16x256xf32> to vector<16x128xf32>
    %4 = vector.extract_strided_slice %2 {offsets = [0, 128], sizes = [16, 128], strides = [1, 1]} : vector<16x256xf32> to vector<16x128xf32>
    %cst_3 = arith.constant 5.000000e-01 : f32
    %5 = vector.broadcast %cst_3 : f32 to vector<16x128xf32>
    %6 = arith.mulf %5, %4 : vector<16x128xf32>
    %cst_4 = arith.constant 0.707106769 : f32
    %7 = vector.broadcast %cst_4 : f32 to vector<16x128xf32>
    %8 = arith.mulf %4, %7 : vector<16x128xf32>
    %9 = math.erf %8 : vector<16x128xf32>
    %cst_5 = arith.constant 1.000000e+00 : f32
    %10 = vector.broadcast %cst_5 : f32 to vector<16x128xf32>
    %11 = arith.addf %10, %9 : vector<16x128xf32>
    %12 = arith.mulf %6, %11 : vector<16x128xf32>
    %13 = arith.mulf %12, %3 : vector<16x128xf32>
    %c0_6 = arith.constant 0 : index
    %c0_7 = arith.constant 0 : index
    %14 = vector.load %arg4[%c0_6, %c0_7] : memref<16x128xf32, #tpu.memory_space<vmem>>, vector<16x128xf32>
    tpu.vector_store %arg4[%c0_6, %c0_7], %13 {strides = array<i32>} : memref<16x128xf32, #tpu.memory_space<vmem>>, vector<16x128xf32>,
    return
  }
  func.func @transform_0(%arg0: i32, %arg1: i32) -> (i32, i32) {
    %c0_i32 = arith.constant 0 : i32
    %c0_i32_0 = arith.constant 0 : i32
    return %arg1, %c0_i32 : i32, i32
  }
  func.func @transform_1(%arg0: i32, %arg1: i32) -> (i32, i32) {
    %c0_i32 = arith.constant 0 : i32
    %c0_i32_0 = arith.constant 0 : i32
    return %c0_i32, %arg0 : i32, i32
  }
  func.func @transform_2(%arg0: i32, %arg1: i32) -> (i32, i32) {
    %c0_i32 = arith.constant 0 : i32
    return %arg1, %arg0 : i32, i32
  }
}

</mosaic_0001>

<bundles_post_ra>
// kernel: tpu_custom_call.1
= control target key start
LH: loop header
LB: loop body
LE: loop exit
PB: predicated region body
PF: predicated region fallthrough
CT: control target
= control target key end

     0   :  { %7 = vsyncpa [#allocation3], 0  ;;  %s380_s0 = inlined_call_operand.hbm [shape: f32[16,128], index: 0, kind: input, shape index: {}]   ;;  %s381_s1 = inlined_call_operand.hbm [shape: f32[128,256], index: 1, kind: input, shape index: {}]   ;;  %s382_s2 = inlined_call_operand.hbm [shape: f32[16,128], index: 2, kind: output, shape index: {}]  }
   0x1   :  { %8 = vsyncpa [#allocation6], 0 }
   0x2   :  { %9 = vsyncpa [#allocation4], 0  ;;  %s315_s9 = smov [#allocation2]   ;;  %s243_s13 = scalar_lea.hbm %s380_s0, 256 }
   0x3   :  { %s15_s10 = sshll.u32 %s315_s9, 4  ;;  %p244_p0 = scmp.ne.s32.totalorder %s380_s0, %s243_s13  ;;  %s16_s10 = int_to_ptr.vmem [resolvable:$true] %s15_s10 }
   0x4   :  { %p247_p1 = scmp.lt.u32.totalorder %s243_s13, %s380_s0 }
   0x6   :  { %p249_p2 = pnand %p247_p1, %p244_p0 }
   0x8   :  { %252 = shalt.err (!%p249_p2)
}
   0x9   :  { %s253_s18 = scalar_lea.vmem %s16_s10, 256  ;;  %p258_p4 = scmp.lt.s32.totalorder %s16_s10, %s16_s10 }
   0xa   :  { %p254_p3 = scmp.ne.s32.totalorder %s16_s10, %s253_s18  ;;  %p259_p5 = scmp.lt.s32.totalorder %s253_s18, %s253_s18 }
   0xc   :  { %p260_p6 = por %p259_p5, %p258_p4 }
   0xe   :  { %p261_p7 = pnand %p260_p6, %p254_p3 }
  0x10   :  { %264 = shalt.err (!%p261_p7)
}
  0x11   :  { %s316_s19 = smov 128   ;;  %s317_s20 = smov 8  }
  0x12   :  { %21 = dma.hbm_to_vmem [thread:$0]  %s380_s0, 256, %s16_s10, [#allocation3], %s316_s19, %s316_s19, %s317_s20  }
  0x13   :  { %s318_s23 = smov [#allocation5]   ;;  %s265_s27 = scalar_lea.hbm %s381_s1, 4096 }
  0x14   :  { %s27_s24 = sshll.u32 %s318_s23, 4  ;;  %p266_p8 = scmp.ne.s32.totalorder %s381_s1, %s265_s27  ;;  %s28_s24 = int_to_ptr.vmem [resolvable:$true] %s27_s24 }
  0x15   :  { %p269_p9 = scmp.lt.u32.totalorder %s265_s27, %s381_s1 }
  0x17   :  { %p271_p10 = pnand %p269_p9, %p266_p8 }
  0x19   :  { %274 = shalt.err (!%p271_p10)
}
  0x1a   :  { %s275_s4 = scalar_lea.vmem %s28_s24, 4096  ;;  %p280_p12 = scmp.lt.s32.totalorder %s28_s24, %s28_s24 }
  0x1b   :  { %p276_p11 = scmp.ne.s32.totalorder %s28_s24, %s275_s4  ;;  %p281_p13 = scmp.lt.s32.totalorder %s275_s4, %s275_s4 }
  0x1d   :  { %p282_p0 = por %p281_p13, %p280_p12 }
  0x1f   :  { %p283_p1 = pnand %p282_p0, %p276_p11 }
  0x21   :  { %286 = shalt.err (!%p283_p1)
}
  0x22   :  { %s319_s0 = smov 256   ;;  %s320_s5 = smov 16  }
  0x23   :  { %33 = dma.hbm_to_vmem [thread:$0]  %s381_s1, 4096, %s28_s24, [#allocation6], %s319_s0, %s319_s0, %s320_s5  }
  0x24   :  { %309 = dma.done.wait [#allocation3], 256  }
  0x25   :  { %310 = vsyncadd [#allocation3], 4294967040 }
  0x26   :  { %311 = dma.done.wait [#allocation6], 4096  }
  0x27   :  { %312 = vsyncadd [#allocation6], 4294963200  ;;  %v321_v0 = vmov 0.0   ;;  %v43_v1 = vld [vmem:[#allocation5 + $0x8] sm:$0xff]  ;;  %v45_v2 = vld [vmem:[#allocation5 + $0x18] sm:$0xff]  ;;  %s322_s1 = smov [#allocation7]  }
  0x28   :  { %138 = vmatprep.mubr.f32.mxu0 %v321_v0  ;;  %144 = vmatprep.mubr.f32.mxu1 %v321_v0  ;;  %v42_v3 = vld [vmem:[#allocation5] sm:$0xff]  ;;  %v183_v4 = vpack.c.bf16 %v45_v2, %v43_v1  ;;  %v44_v5 = vld [vmem:[#allocation5 + $0x10] sm:$0xff]  ;;  %v47_v6 = vld [vmem:[#allocation5 + $0x28] sm:$0xff]  ;;  %s170_s8 = sshll.u32 %s322_s1, 4  ;;  %s171_s8 = int_to_ptr.vmem [resolvable:$true] %s170_s8 }
  0x29   :  { %v49_v7 = vld [vmem:[#allocation5 + $0x38] sm:$0xff]  ;;  %v185_v8 = vpack.c.bf16 %v44_v5, %v42_v3  ;;  %v46_v10 = vld [vmem:[#allocation5 + $0x20] sm:$0xff]  ;;  %v48_v11 = vld [vmem:[#allocation5 + $0x30] sm:$0xff]  ;;  %s287_s9 = scalar_lea.vmem %s171_s8, 256  ;;  %p292_p3 = scmp.lt.s32.totalorder %s171_s8, %s171_s8 }
  0x2a   :  { %v187_v9 = vpack.c.bf16 %v49_v7, %v47_v6  ;;  %v51_v12 = vld [vmem:[#allocation5 + $0x48] sm:$0xff]  ;;  %184 = vmatprep.subr.bf16.mxu0 %v183_v4  ;;  %215 = vmatprep.subr.bf16.mxu1 %v183_v4  ;;  %v53_v13 = vld [vmem:[#allocation5 + $0x58] sm:$0xff]  ;;  %v189_v14 = vpack.c.bf16 %v48_v11, %v46_v10  ;;  %v50_v16 = vld [vmem:[#allocation5 + $0x40] sm:$0xff]  ;;  %p288_p2 = scmp.ne.s32.totalorder %s171_s8, %s287_s9  ;;  %p293_p4 = scmp.lt.s32.totalorder %s287_s9, %s287_s9 }
  0x2b   :  { %186 = vmatpush1.bf16.msra.mxu0 %v185_v8  ;;  %223 = vmatpush1.bf16.msra.mxu1 %v185_v8  ;;  %v191_v15 = vpack.c.bf16 %v53_v13, %v51_v12  ;;  %v52_v17 = vld [vmem:[#allocation5 + $0x50] sm:$0xff]  ;;  %v55_v18 = vld [vmem:[#allocation5 + $0x68] sm:$0xff]  ;;  %v57_v19 = vld [vmem:[#allocation5 + $0x78] sm:$0xff] }
  0x2c   :  { %188 = vmatprep.subr.bf16.mxu0 %v187_v9  ;;  %216 = vmatprep.subr.bf16.mxu1 %v187_v9  ;;  %v193_v20 = vpack.c.bf16 %v52_v17, %v50_v16  ;;  %v195_v21 = vpack.c.bf16 %v57_v19, %v55_v18  ;;  %v54_v22 = vld [vmem:[#allocation5 + $0x60] sm:$0xff]  ;;  %v56_v23 = vld [vmem:[#allocation5 + $0x70] sm:$0xff]  ;;  %v59_v24 = vld [vmem:[#allocation5 + $0x88] sm:$0xff]  ;;  %p294_p5 = por %p293_p4, %p292_p3 }
  0x2d   :  { %v61_v25 = vld [vmem:[#allocation5 + $0x98] sm:$0xff]  ;;  %v197_v26 = vpack.c.bf16 %v56_v23, %v54_v22  ;;  %v58_v28 = vld [vmem:[#allocation5 + $0x80] sm:$0xff]  ;;  %v60_v29 = vld [vmem:[#allocation5 + $0x90] sm:$0xff] }
  0x2e   :  { %v199_v27 = vpack.c.bf16 %v61_v25, %v59_v24  ;;  %v63_v30 = vld [vmem:[#allocation5 + $0xa8] sm:$0xff]  ;;  %v65_v31 = vld [vmem:[#allocation5 + $0xb8] sm:$0xff]  ;;  %v201_v32 = vpack.c.bf16 %v60_v29, %v58_v28  ;;  %v62_v34 = vld [vmem:[#allocation5 + $0xa0] sm:$0xff]  ;;  %p295_p6 = pnand %p294_p5, %p288_p2 }
  0x2f   :  { %190 = vmatpush1.bf16.msra.mxu0 %v189_v14  ;;  %224 = vmatpush1.bf16.msra.mxu1 %v189_v14  ;;  %v203_v33 = vpack.c.bf16 %v65_v31, %v63_v30  ;;  %v64_v35 = vld [vmem:[#allocation5 + $0xb0] sm:$0xff]  ;;  %v67_v36 = vld [vmem:[#allocation5 + $0xc8] sm:$0xff]  ;;  %v69_v37 = vld [vmem:[#allocation5 + $0xd8] sm:$0xff] }
  0x30   :  { %192 = vmatprep.subr.bf16.mxu0 %v191_v15  ;;  %217 = vmatprep.subr.bf16.mxu1 %v191_v15  ;;  %v205_v38 = vpack.c.bf16 %v64_v35, %v62_v34  ;;  %v207_v39 = vpack.c.bf16 %v69_v37, %v67_v36  ;;  %v66_v40 = vld [vmem:[#allocation5 + $0xc0] sm:$0xff]  ;;  %v68_v41 = vld [vmem:[#allocation5 + $0xd0] sm:$0xff]  ;;  %v71_v42 = vld [vmem:[#allocation5 + $0xe8] sm:$0xff] }
  0x31   :  { %v73_v43 = vld [vmem:[#allocation5 + $0xf8] sm:$0xff]  ;;  %v209_v44 = vpack.c.bf16 %v68_v41, %v66_v40  ;;  %v70_v46 = vld [vmem:[#allocation5 + $0xe0] sm:$0xff]  ;;  %v72_v47 = vld [vmem:[#allocation5 + $0xf0] sm:$0xff] }
  0x32   :  { %v211_v45 = vpack.c.bf16 %v73_v43, %v71_v42  ;;  %v213_v48 = vpack.c.bf16 %v72_v47, %v70_v46  ;;  %v40_v49 = vld [vmem:[#allocation2] sm:$0xff]  ;;  %v41_v50 = vld [vmem:[#allocation2 + $0x8] sm:$0xff] }
  0x33   :  { %194 = vmatpush1.bf16.msra.mxu0 %v193_v20  ;;  %225 = vmatpush1.bf16.msra.mxu1 %v193_v20 }
  0x34   :  { %196 = vmatprep.subr.bf16.mxu0 %v195_v21  ;;  %218 = vmatprep.subr.bf16.mxu1 %v195_v21 }
  0x37   :  { %198 = vmatpush1.bf16.msra.mxu0 %v197_v26  ;;  %226 = vmatpush1.bf16.msra.mxu1 %v197_v26 }
  0x38   :  { %200 = vmatprep.subr.bf16.mxu0 %v199_v27  ;;  %219 = vmatprep.subr.bf16.mxu1 %v199_v27 }
  0x3b   :  { %202 = vmatpush1.bf16.msra.mxu0 %v201_v32  ;;  %227 = vmatpush1.bf16.msra.mxu1 %v201_v32 }
  0x3c   :  { %204 = vmatprep.subr.bf16.mxu0 %v203_v33  ;;  %220 = vmatprep.subr.bf16.mxu1 %v203_v33 }
  0x3f   :  { %206 = vmatpush1.bf16.msra.mxu0 %v205_v38  ;;  %228 = vmatpush1.bf16.msra.mxu1 %v205_v38 }
  0x40   :  { %208 = vmatprep.subr.bf16.mxu0 %v207_v39  ;;  %221 = vmatprep.subr.bf16.mxu1 %v207_v39 }
  0x43   :  { %210 = vmatpush1.bf16.msra.mxu0 %v209_v44  ;;  %229 = vmatpush1.bf16.msra.mxu1 %v209_v44 }
  0x44   :  { %212 = vmatprep.subr.bf16.mxu0 %v211_v45  ;;  %222 = vmatprep.subr.bf16.mxu1 %v211_v45 }
  0x47   :  { %214 = vmatpush1.bf16.msra.mxu0 %v213_v48  ;;  %230 = vmatpush1.bf16.msra.mxu1 %v213_v48 }
  0x4a   :  { %139 = vmatmul.mubr.f32.vlgmr.msra.gmra.mrb[0].mxu0 %v40_v49  ;;  %145 = vmatmul.mubr.f32.vlgmr.msra.gmra.mrb[0].mxu1 %v41_v50 }
 0x11d   :  { %v140_v51 = vpop.f32.mrb[0].mxu0  ;;  %v146_v52 = vpop.f32.mrb[0].mxu1 }
 0x11e   :  { %v142_v53 = vpop.f32.mrb[1].mxu0  ;;  %v148_v54 = vpop.f32.mrb[1].mxu1 }
 0x11f   :  { %v153_v55 = vmul.f32 0.70710677, %v142_v53  ;;  %v154_v56 = vmul.f32 0.70710677, %v148_v54  ;;  %v151_v59 = vmul.f32 0.5, %v142_v53  ;;  %v152_v61 = vmul.f32 0.5, %v148_v54 }
 0x121   :  { %239 = verf.f32 %v153_v55 }
 0x122   :  { %241 = verf.f32 %v154_v56 }
 0x12b   :  { %v240_v57 = vpop.eup %239 }
 0x12c   :  { %v242_v58 = vpop.eup %241  ;;  %v157_v60 = vadd.f32 1.0, %v240_v57 }
 0x12d   :  { %v158_v62 = vadd.f32 1.0, %v242_v58 }
 0x12e   :  { %v159_v63 = vmul.f32 %v157_v60, %v151_v59 }
 0x12f   :  { %v160_v0 = vmul.f32 %v158_v62, %v152_v61 }
 0x130   :  { %v161_v1 = vmul.f32 %v159_v63, %v140_v51 }
 0x131   :  { %v162_v2 = vmul.f32 %v160_v0, %v146_v52 }
 0x132   :  { %163 = vst [vmem:[#allocation7] sm:$0xff] %v161_v1 }
 0x133   :  { %164 = vst [vmem:[#allocation7 + $0x8] sm:$0xff] %v162_v2 }
 0x134   :  { %298 = shalt.err (!%p295_p6)
}
 0x135   :  { %s299_s12 = scalar_lea.hbm %s382_s2, 256 }
 0x136   :  { %p300_p7 = scmp.ne.s32.totalorder %s382_s2, %s299_s12  ;;  %p303_p8 = scmp.lt.u32.totalorder %s299_s12, %s382_s2 }
 0x138   :  { %p305_p9 = pnand %p303_p8, %p300_p7 }
 0x13a   :  { %308 = shalt.err (!%p305_p9)
}
 0x13b   :  { %176 = dma.vmem_to_hbm [thread:$0]  %s171_s8, 256, %s382_s2, [#allocation4], %s316_s19, %s316_s19, %s317_s20  }
 0x13c   :  { %313 = dma.done.wait [#allocation4], 256  }
 0x13d   :  { %314 = vsyncadd [#allocation4], 4294967040 }
 0x13e   :  { %180 = vsyncpa [#allocation3], 1 }
 0x13f   :  { %181 = vsyncpa [#allocation6], 1 }
 0x140   :  { %182 = vsyncpa [#allocation4], 1 }

</bundles_post_ra>
